<compile_context>
chip_gen: v7x
topology: tpu7x:2x2x1
jax: 0.10.0
libtpu: 0.0.40
codegen_flags: <defaults>
</compile_context>

<pallas_src>
import functools

import jax
import jax.numpy as jnp
from jax.experimental import pallas as pl
from jax.experimental.pallas import tpu as pltpu


def _patch_merging_kernel(x_ref, wa_ref, wb_ref, b_ref, o_ref):
    """Fused 2x2 patch merge + LayerNorm(4C) + Linear(4C -> 2C).

    x_ref : (th, 2, wp, 2C)   dim 1 = H-row parity (even/odd row);
                              last dim = [even-col channels | odd-col channels]
    wa_ref: (2C, 2Cout)       gamma-folded weight rows for the even-row half [W0; W2]
    wb_ref: (2C, 2Cout)       gamma-folded weight rows for the odd-row half  [W1; W3]
    b_ref : (1, 2Cout)        beta @ W^T
    o_ref : (th*wp, 2Cout)    merged output rows
    """
    th, _, wp, c2 = x_ref.shape
    m = th * wp

    blk = x_ref[...]                                            # (th, 2, wp, 2C)
    r0 = blk[:, 0, :, :].reshape(m, c2).astype(jnp.float32)     # [x0 | x2]
    r1 = blk[:, 1, :, :].reshape(m, c2).astype(jnp.float32)     # [x1 | x3]

    # LayerNorm statistics over the full 4C concatenation, single pass, f32.
    inv_n = 1.0 / (2 * c2)
    s = jnp.sum(r0, axis=-1, keepdims=True) + jnp.sum(r1, axis=-1, keepdims=True)
    s2 = (jnp.sum(r0 * r0, axis=-1, keepdims=True)
          + jnp.sum(r1 * r1, axis=-1, keepdims=True))
    mean = s * inv_n
    var = jnp.maximum(s2 * inv_n - mean * mean, 0.0)   # clamp against cancellation
    rstd = jax.lax.rsqrt(var + 1e-5)                   # eps of nn.LayerNorm

    n0 = ((r0 - mean) * rstd).astype(wa_ref.dtype)
    n1 = ((r1 - mean) * rstd).astype(wb_ref.dtype)

    # gamma/beta were folded into wa/wb/b in the wrapper.
    acc = jnp.dot(n0, wa_ref[...], preferred_element_type=jnp.float32)
    acc = acc + jnp.dot(n1, wb_ref[...], preferred_element_type=jnp.float32)
    acc = acc + b_ref[...]
    o_ref[...] = acc.astype(o_ref.dtype)


def _vmem_policy():
    """(vmem_budget, vmem_limit_cap, max_merged_rows) for the local TPU generation."""
    try:
        cap = int(pltpu.get_tpu_info().vmem_capacity_bytes)
    except Exception:
        cap = 64 * 1024 * 1024                      # conservative (v7x per-core)
    if cap <= 64 * 1024 * 1024:                     # v7x: 64 MiB per TensorCore
        return 28 << 20, 40 << 20, 2048
    return 56 << 20, 96 << 20, 4096                 # v5e / v6e: 128 MiB VMEM


def _choose_row_tile(batch, hp, wp, c2, c_out2, *, x_bytes, out_bytes, w_bytes,
                     max_merged_rows, vmem_budget):
    """Pick th (a divisor of hp) so one pipelined step fits the VMEM budget."""
    # Output block's second-minor dim (th*wp) must be a multiple of the sublane
    # tile for the output dtype (8 f32, 16 bf16, 32 int8) unless th == hp.
    out_align = max(1, (8 * 4) // max(1, out_bytes))
    w_resident = 2 * (2 * c2) * c_out2 * w_bytes + 8 * c_out2   # both weights x2 bufs + bias

    def step_bytes(th):
        m = th * wp
        in_blk = 2 * th * 2 * wp * c2 * x_bytes     # double-buffered input block
        out_blk = 2 * m * c_out2 * out_bytes        # double-buffered output block
        f32_tmp = 5 * m * c2 * 4 + m * c_out2 * 4   # r0, r1, n0, n1 + f32 accumulator
        return in_blk + out_blk + f32_tmp + w_resident + (1 << 20)

    divisors = [d for d in range(1, hp + 1) if hp % d == 0]
    aligned = [d for d in divisors if (d * wp) % out_align == 0 or d == hp]
    fits = [d for d in aligned
            if d * wp <= max_merged_rows and step_bytes(d) <= vmem_budget]
    if not fits:                                    # relax the row cap first
        fits = [d for d in aligned if step_bytes(d) <= vmem_budget]
    if not fits:                                    # last resort (alignment is hard)
        fits = [min(aligned)]

    def steps(d):
        return batch * (hp // d)

    best = max(fits)
    geq2 = [d for d in fits if steps(d) >= 2]
    if geq2 and max(geq2) * 2 >= best:              # keep both v7x TensorCores busy,
        best = max(geq2)                            # but never shrink the tile >2x
        even = [d for d in geq2 if steps(d) % 2 == 0]
        if even and max(even) * 2 >= best:
            best = max(even)
    return best, step_bytes(best)


def patch_merging(x, H, W, gamma, beta, weight, *, mxu_dtype=jnp.bfloat16):
    """Semantics of PatchMerging.forward(x, H, W).

    x:      (B, H*W, C)
    gamma:  (4C,)    LayerNorm weight
    beta:   (4C,)    LayerNorm bias
    weight: (2C, 4C) nn.Linear(4C, 2C, bias=False) weight (PyTorch layout)
    returns (B, ceil(H/2)*ceil(W/2), 2C)
    """
    B, L, C = x.shape
    assert L == H * W, "input feature has wrong size"

    xv = x.reshape(B, H, W, C)
    pad_h, pad_w = H % 2, W % 2
    if pad_h or pad_w:                              # zero-pad odd H/W, like F.pad
        xv = jnp.pad(xv, ((0, 0), (0, pad_h), (0, pad_w), (0, 0)))
    hp, wp = (H + pad_h) // 2, (W + pad_w) // 2
    c2, c_out2 = 2 * C, 2 * C

    # Fold even/odd columns into the channel dim (row-major reshape of the
    # contiguous padded array): last dim = [even-col C | odd-col C].
    # TODO(synk): if XLA materializes this reshape for sublane-unaligned W
    # (e.g. Swin 28/14/7 stages), switch to memory_space=pl.ANY with
    # scalar-prefetched row addressing to keep the gather fully in-kernel.
    xv = xv.reshape(B, hp, 2, wp, c2)

    # Fold the LayerNorm affine into the projection and reorder weight rows to
    # match the kernel's [x0|x2] / [x1|x3] channel layout (no in-kernel concat).
    w_t = weight.astype(jnp.float32).T                          # (4C, 2C)
    w_eff = gamma.astype(jnp.float32)[:, None] * w_t            # (4C, 2C)
    b_eff = (beta.astype(jnp.float32) @ w_t).reshape(1, c_out2)  # (1, 2C)
    w_a = jnp.concatenate([w_eff[0:C], w_eff[2 * C:3 * C]], axis=0).astype(mxu_dtype)
    w_b = jnp.concatenate([w_eff[C:2 * C], w_eff[3 * C:4 * C]], axis=0).astype(mxu_dtype)

    vmem_budget, vmem_limit_cap, rows_cap = _vmem_policy()
    th, step_bytes = _choose_row_tile(
        B, hp, wp, c2, c_out2,
        x_bytes=xv.dtype.itemsize,
        out_bytes=x.dtype.itemsize,
        w_bytes=jnp.dtype(mxu_dtype).itemsize,
        max_merged_rows=rows_cap, vmem_budget=vmem_budget)
    grid = (B, hp // th)
    vmem_limit = int(min(vmem_limit_cap, max(int(step_bytes * 1.25), 16 << 20)))

    return pl.pallas_call(
        _patch_merging_kernel,
        out_shape=jax.ShapeDtypeStruct((B, hp * wp, c_out2), x.dtype),
        grid=grid,
        in_specs=[
            pl.BlockSpec((None, th, 2, wp, c2), lambda b, i: (b, i, 0, 0, 0)),
            pl.BlockSpec((c2, c_out2), lambda b, i: (0, 0)),
            pl.BlockSpec((c2, c_out2), lambda b, i: (0, 0)),
            pl.BlockSpec((1, c_out2), lambda b, i: (0, 0)),
        ],
        out_specs=pl.BlockSpec((None, th * wp, c_out2), lambda b, i: (b, i, 0)),
        compiler_params=pltpu.CompilerParams(
            dimension_semantics=("parallel", "parallel"),
            vmem_limit_bytes=vmem_limit),
    )(xv, w_a, w_b, b_eff)


def _reference(x, H, W, gamma, beta, weight):
    """Pure-JAX f32 reference matching the PyTorch module."""
    B, L, C = x.shape
    xv = x.reshape(B, H, W, C)
    if H % 2 or W % 2:
        xv = jnp.pad(xv, ((0, 0), (0, H % 2), (0, W % 2), (0, 0)))
    x0 = xv[:, 0::2, 0::2, :]
    x1 = xv[:, 1::2, 0::2, :]
    x2 = xv[:, 0::2, 1::2, :]
    x3 = xv[:, 1::2, 1::2, :]
    xm = jnp.concatenate([x0, x1, x2, x3], axis=-1).reshape(B, -1, 4 * C)
    mean = jnp.mean(xm, axis=-1, keepdims=True)
    var = jnp.mean((xm - mean) ** 2, axis=-1, keepdims=True)
    xn = (xm - mean) / jnp.sqrt(var + 1e-5) * gamma + beta
    return xn @ weight.T


if __name__ == "__main__":
    # Small shapes consistent with the module: dim (C) = 4, H = W = 16, B = 2.
    B, H, W, C = 2, 16, 16, 4
    key = jax.random.PRNGKey(0)
    kx, kw, kg, kb = jax.random.split(key, 4)

    x = jax.random.normal(kx, (B, H * W, C), dtype=jnp.float32)
    weight = 0.05 * jax.random.normal(kw, (2 * C, 4 * C), dtype=jnp.float32)
    gamma = 1.0 + 0.1 * jax.random.normal(kg, (4 * C,), dtype=jnp.float32)
    beta = 0.05 * jax.random.normal(kb, (4 * C,), dtype=jnp.float32)

    ref = _reference(x, H, W, gamma, beta, weight)

    # f32 MXU path: tight check against the f32 reference.
    f32_fn = jax.jit(functools.partial(patch_merging, H=H, W=W,
                                       mxu_dtype=jnp.float32))
    out_f32 = jax.block_until_ready(
        f32_fn(x, gamma=gamma, beta=beta, weight=weight))
    assert out_f32.shape == (B, (H // 2) * (W // 2), 2 * C), out_f32.shape
    assert jnp.allclose(out_f32, ref, atol=2e-4, rtol=2e-4), (
        "f32 mismatch, max|err|=%e" % float(jnp.max(jnp.abs(out_f32 - ref))))

    # Default bf16-MXU path (f32 LayerNorm, f32 accumulation): loose check.
    bf16_fn = jax.jit(functools.partial(patch_merging, H=H, W=W))
    out_bf16 = jax.block_until_ready(
        bf16_fn(x, gamma=gamma, beta=beta, weight=weight))
    assert out_bf16.shape == (B, (H // 2) * (W // 2), 2 * C), out_bf16.shape
    assert jnp.allclose(out_bf16, ref, atol=3e-2, rtol=3e-2), (
        "bf16 mismatch, max|err|=%e" % float(jnp.max(jnp.abs(out_bf16 - ref))))

    print("KERNEL_OK")
</pallas_src>

<mosaic_0001>
module attributes {stable_mosaic.version = 11 : i64} {
  func.func @_patch_merging_kernel(%arg0: i32, %arg1: i32, %arg2: memref<1x8x2x8x8xf32, #tpu.memory_space<vmem>>, %arg3: memref<8x8xf32, #tpu.memory_space<vmem>>, %arg4: memref<8x8xf32, #tpu.memory_space<vmem>>, %arg5: memref<1x8xf32, #tpu.memory_space<vmem>>, %arg6: memref<1x64x8xf32, #tpu.memory_space<vmem>>) attributes {dimension_semantics = [#tpu.dimension_semantics<parallel>, #tpu.dimension_semantics<parallel>], iteration_bounds = array<i64: 2, 1>, scalar_prefetch = 0 : i64, scratch_operands = 0 : i64, tpu.core_type = #tpu.core_type<tc>, window_params = [{transform_indices = @transform_0, window_bounds = array<i64: 1, 8, 2, 8, 8>}, {pipeline_mode = #tpu.pipeline_mode<synchronous>, transform_indices = @transform_1, window_bounds = array<i64: 8, 8>}, {pipeline_mode = #tpu.pipeline_mode<synchronous>, transform_indices = @transform_2, window_bounds = array<i64: 8, 8>}, {pipeline_mode = #tpu.pipeline_mode<synchronous>, transform_indices = @transform_3, window_bounds = array<i64: 1, 8>}, {transform_indices = @transform_4, window_bounds = array<i64: 1, 64, 8>}]} {
    %c0 = arith.constant 0 : index
    %c0_0 = arith.constant 0 : index
    %c0_1 = arith.constant 0 : index
    %c0_2 = arith.constant 0 : index
    %c0_3 = arith.constant 0 : index
    %0 = vector.load %arg2[%c0, %c0_0, %c0_1, %c0_2, %c0_3] : memref<1x8x2x8x8xf32, #tpu.memory_space<vmem>>, vector<1x8x2x8x8xf32>
    %1 = vector.shape_cast %0 : vector<1x8x2x8x8xf32> to vector<8x2x8x8xf32>
    %2 = vector.extract_strided_slice %1 {offsets = [0, 0, 0, 0], sizes = [8, 1, 8, 8], strides = [1, 1, 1, 1]} : vector<8x2x8x8xf32> to vector<8x1x8x8xf32>
    %3 = vector.shape_cast %2 : vector<8x1x8x8xf32> to vector<8x8x8xf32>
    %4 = vector.shape_cast %3 : vector<8x8x8xf32> to vector<64x8xf32>
    %5 = vector.extract_strided_slice %1 {offsets = [0, 1, 0, 0], sizes = [8, 1, 8, 8], strides = [1, 1, 1, 1]} : vector<8x2x8x8xf32> to vector<8x1x8x8xf32>
    %6 = vector.shape_cast %5 : vector<8x1x8x8xf32> to vector<8x8x8xf32>
    %7 = vector.shape_cast %6 : vector<8x8x8xf32> to vector<64x8xf32>
    %cst = arith.constant dense<0.000000e+00> : vector<64xf32>
    %8 = vector.multi_reduction <add>, %4, %cst [1] : vector<64x8xf32> to vector<64xf32>
    %9 = vector.shape_cast %8 : vector<64xf32> to vector<64x1xf32>
    %cst_4 = arith.constant dense<0.000000e+00> : vector<64xf32>
    %10 = vector.multi_reduction <add>, %7, %cst_4 [1] : vector<64x8xf32> to vector<64xf32>
    %11 = vector.shape_cast %10 : vector<64xf32> to vector<64x1xf32>
    %12 = arith.addf %9, %11 : vector<64x1xf32>
    %13 = arith.mulf %4, %4 : vector<64x8xf32>
    %cst_5 = arith.constant dense<0.000000e+00> : vector<64xf32>
    %14 = vector.multi_reduction <add>, %13, %cst_5 [1] : vector<64x8xf32> to vector<64xf32>
    %15 = vector.shape_cast %14 : vector<64xf32> to vector<64x1xf32>
    %16 = arith.mulf %7, %7 : vector<64x8xf32>
    %cst_6 = arith.constant dense<0.000000e+00> : vector<64xf32>
    %17 = vector.multi_reduction <add>, %16, %cst_6 [1] : vector<64x8xf32> to vector<64xf32>
    %18 = vector.shape_cast %17 : vector<64xf32> to vector<64x1xf32>
    %19 = arith.addf %15, %18 : vector<64x1xf32>
    %cst_7 = arith.constant 6.250000e-02 : f32
    %20 = vector.broadcast %cst_7 : f32 to vector<64x1xf32>
    %21 = arith.mulf %12, %20 : vector<64x1xf32>
    %cst_8 = arith.constant 6.250000e-02 : f32
    %22 = vector.broadcast %cst_8 : f32 to vector<64x1xf32>
    %23 = arith.mulf %19, %22 : vector<64x1xf32>
    %24 = arith.mulf %21, %21 : vector<64x1xf32>
    %25 = arith.subf %23, %24 : vector<64x1xf32>
    %cst_9 = arith.constant 0.000000e+00 : f32
    %26 = vector.broadcast %cst_9 : f32 to vector<64x1xf32>
    %27 = arith.maximumf %25, %26 : vector<64x1xf32>
    %cst_10 = arith.constant 9.99999974E-6 : f32
    %28 = vector.broadcast %cst_10 : f32 to vector<64x1xf32>
    %29 = arith.addf %27, %28 : vector<64x1xf32>
    %30 = math.rsqrt %29 : vector<64x1xf32>
    %31 = vector.broadcast %21 : vector<64x1xf32> to vector<64x8xf32>
    %32 = arith.subf %4, %31 : vector<64x8xf32>
    %33 = vector.broadcast %30 : vector<64x1xf32> to vector<64x8xf32>
    %34 = arith.mulf %32, %33 : vector<64x8xf32>
    %35 = vector.broadcast %21 : vector<64x1xf32> to vector<64x8xf32>
    %36 = arith.subf %7, %35 : vector<64x8xf32>
    %37 = vector.broadcast %30 : vector<64x1xf32> to vector<64x8xf32>
    %38 = arith.mulf %36, %37 : vector<64x8xf32>
    %c0_11 = arith.constant 0 : index
    %c0_12 = arith.constant 0 : index
    %39 = vector.load %arg3[%c0_11, %c0_12] : memref<8x8xf32, #tpu.memory_space<vmem>>, vector<8x8xf32>
    %cst_13 = arith.constant dense<0.000000e+00> : vector<64x8xf32>
    %40 = tpu.matmul %34, %39, %cst_13 {dimension_numbers = #tpu.dot_dimension_numbers<[1], [0], [0], [1], [0, 0, 1, 1], [], []>} : vector<64x8xf32>, vector<8x8xf32>, vector<64x8xf32> -> vector<64x8xf32>
    %c0_14 = arith.constant 0 : index
    %c0_15 = arith.constant 0 : index
    %41 = vector.load %arg4[%c0_14, %c0_15] : memref<8x8xf32, #tpu.memory_space<vmem>>, vector<8x8xf32>
    %cst_16 = arith.constant dense<0.000000e+00> : vector<64x8xf32>
    %42 = tpu.matmul %38, %41, %cst_16 {dimension_numbers = #tpu.dot_dimension_numbers<[1], [0], [0], [1], [0, 0, 1, 1], [], []>} : vector<64x8xf32>, vector<8x8xf32>, vector<64x8xf32> -> vector<64x8xf32>
    %43 = arith.addf %40, %42 : vector<64x8xf32>
    %c0_17 = arith.constant 0 : index
    %c0_18 = arith.constant 0 : index
    %44 = vector.load %arg5[%c0_17, %c0_18] : memref<1x8xf32, #tpu.memory_space<vmem>>, vector<1x8xf32>
    %45 = vector.broadcast %44 : vector<1x8xf32> to vector<64x8xf32>
    %46 = arith.addf %43, %45 : vector<64x8xf32>
    %c0_19 = arith.constant 0 : index
    %c0_20 = arith.constant 0 : index
    %c0_21 = arith.constant 0 : index
    %47 = vector.load %arg6[%c0_19, %c0_20, %c0_21] : memref<1x64x8xf32, #tpu.memory_space<vmem>>, vector<1x64x8xf32>
    %48 = vector.shape_cast %47 : vector<1x64x8xf32> to vector<64x8xf32>
    %49 = vector.shape_cast %46 : vector<64x8xf32> to vector<1x64x8xf32>
    tpu.vector_store %arg6[%c0_19, %c0_20, %c0_21], %49 {strides = array<i32>} : memref<1x64x8xf32, #tpu.memory_space<vmem>>, vector<1x64x8xf32>,
    return
  }
  func.func @transform_0(%arg0: i32, %arg1: i32) -> (i32, i32, i32, i32, i32) {
    %c0_i32 = arith.constant 0 : i32
    %c0_i32_0 = arith.constant 0 : i32
    %c0_i32_1 = arith.constant 0 : i32
    %c0_i32_2 = arith.constant 0 : i32
    return %arg0, %arg1, %c0_i32, %c0_i32_0, %c0_i32_1 : i32, i32, i32, i32, i32
  }
  func.func @transform_1(%arg0: i32, %arg1: i32) -> (i32, i32) {
    %c0_i32 = arith.constant 0 : i32
    %c0_i32_0 = arith.constant 0 : i32
    %c0_i32_1 = arith.constant 0 : i32
    return %c0_i32, %c0_i32_0 : i32, i32
  }
  func.func @transform_2(%arg0: i32, %arg1: i32) -> (i32, i32) {
    %c0_i32 = arith.constant 0 : i32
    %c0_i32_0 = arith.constant 0 : i32
    %c0_i32_1 = arith.constant 0 : i32
    return %c0_i32, %c0_i32_0 : i32, i32
  }
  func.func @transform_3(%arg0: i32, %arg1: i32) -> (i32, i32) {
    %c0_i32 = arith.constant 0 : i32
    %c0_i32_0 = arith.constant 0 : i32
    %c0_i32_1 = arith.constant 0 : i32
    return %c0_i32, %c0_i32_0 : i32, i32
  }
  func.func @transform_4(%arg0: i32, %arg1: i32) -> (i32, i32, i32) {
    %c0_i32 = arith.constant 0 : i32
    %c0_i32_0 = arith.constant 0 : i32
    return %arg0, %arg1, %c0_i32 : i32, i32, i32
  }
}

</mosaic_0001>

<bundles_post_ra>
// kernel: patch_merging.1
= control target key start
LH: loop header
LB: loop body
LE: loop exit
PB: predicated region body
PF: predicated region fallthrough
CT: control target
= control target key end

     0   :  { %s1019_s15 = smov 0   ;;  %s1021_s16 = smov 0   ;;  %s1257_s0 = inlined_call_operand.vmem [shape: f32[2,8,2,8,8], index: 0, kind: input, shape index: {}]   ;;  %s1258_s1 = inlined_call_operand.vmem [shape: f32[8,8], index: 1, kind: input, shape index: {}]   ;;  %s1259_s2 = inlined_call_operand.vmem [shape: f32[8,8], index: 2, kind: input, shape index: {}]   ;;  %s1260_s3 = inlined_call_operand.vmem [shape: f32[1,8], index: 3, kind: input, shape index: {}]   ;;  %s1261_s4 = inlined_call_operand.vmem [shape: f32[2,64,8], index: 4, kind: output, shape index: {}]  }
   0x1   :  { %s1023_s17 = smov 0  }
   0x2 LB: > { %s26_s18 = sadd.s32 1, %s988_s16  ;;  %p850_p0 = scmp.ge.s32.totalorder %s992_s17, 1  ;;  %s992_s17 = sphi %s1023_s17, %s14_s17   ;;  %s988_s16 = sphi %s1021_s16, %s1263_s16   ;;  %s984_s15 = sphi %s1019_s15, %s1262_s15  }
   0x3   : > { %p28_p1 = scmp.ge.s32.totalorder %s26_s18, 2  ;;  %p184_p2 = scmp.lt.s32.totalorder %s992_s17, 3 }
   0x5   : > { %s1265_s18 = smov (%p28_p1, %s26_s18), 0  ;;  %p185_p3 = pnand %p850_p0, %p184_p2 }
   0x6   : > { %p220_p4 = scmp.lt.s32.totalorder (!%p185_p3), %s984_s15, 1  ;;  %vm256_vm0 = vcmask (!%p185_p3), 64512   ;;  %v474_v54 = vld [vmem:[%s1259_s2] sm:$0xff] (!%p185_p3) }
   0x7   : > { %188 = sbr.rel (%p185_p3) target bundleno = 462 (0x1ce), region = 36  ;;  %v473_v55 = vld [vmem:[%s1258_s1] sm:$0xff] (!%p185_p3)  ;;  %894 = vmatprep.subr.mxu1 (!%p185_p3), %v474_v54 }
   0x8   : > { %908 = vmatprep.subr.mxu0 (!%p185_p3), %v473_v55  ;;  %895 = vmatpush3.msra.mxu1 (!%p185_p3), %v474_v54 }
   0x9   : > { %909 = vmatpush3.msra.mxu0 (!%p185_p3), %v473_v55 }
   0xe   : > { %s1267_s15 = smov (!%p220_p4, %s984_s15), 1 }
   0xf   : > { %s874_s19 = sshll.u32 %s1267_s15, 7  ;;  %s875_s27 = sshll.u32 %s1267_s15, 6 }
  0x10   : > { %s1043_s22 = scalar_lea.vmem %s1257_s0, %s874_s19  ;;  %s1230_s6 = scalar_lea.vmem %s1261_s4, %s875_s27 }
  0x11   : > { %v1046_v0 = vld [vmem:[%s1043_s22 + $0x10] sm:$0xff]  ;;  %v1049_v1 = vld [vmem:[%s1043_s22] sm:$0xff]  ;;  %v1052_v2 = vld [vmem:[%s1043_s22 + $0x18] sm:$0xff] }
  0x12   : > { %v260_v3 = vsel %vm256_vm0, %v1046_v0, 0.0  ;;  %v257_v4 = vsel %vm256_vm0, %v1049_v1, 0.0  ;;  %v1059_v5 = vld [vmem:[%s1043_s22 + $0x8] sm:$0xff]  ;;  %v284_v6 = vsel %vm256_vm0, %v1052_v2, 0.0  ;;  %v313_v9 = vmul.f32 %v1049_v1, %v1049_v1  ;;  %v1081_v17 = vld [vmem:[%s1043_s22 + $0x20] sm:$0xff]  ;;  %v1088_v20 = vld [vmem:[%s1043_s22 + $0x38] sm:$0xff] }
  0x13   : > { %261 = vadd.xlane.f32.xlu1 %v260_v3  ;;  %258 = vadd.xlane.f32.xlu0 %v257_v4  ;;  %v281_v7 = vsel %vm256_vm0, %v1059_v5, 0.0  ;;  %v345_v8 = vmul.f32 %v1059_v5, %v1059_v5  ;;  %v346_v12 = vmul.f32 %v1052_v2, %v1052_v2  ;;  %v314_v13 = vmul.f32 %v1046_v0, %v1046_v0  ;;  %v1078_v16 = vld [vmem:[%s1043_s22 + $0x28] sm:$0xff]  ;;  %v1091_v21 = vld [vmem:[%s1043_s22 + $0x30] sm:$0xff]  ;;  %v1113_v33 = vld [vmem:[%s1043_s22 + $0x40] sm:$0xff] }
  0x14   : > { %v321_v11 = vsel %vm256_vm0, %v313_v9, 0.0  ;;  %v287_v18 = vsel %vm256_vm0, %v1078_v16, 0.0  ;;  %v263_v19 = vsel %vm256_vm0, %v1081_v17, 0.0  ;;  %v290_v22 = vsel %vm256_vm0, %v1088_v20, 0.0  ;;  %v1110_v32 = vld [vmem:[%s1043_s22 + $0x48] sm:$0xff]  ;;  %v1120_v36 = vld [vmem:[%s1043_s22 + $0x58] sm:$0xff] }
  0x15   : > { %v353_v10 = vsel %vm256_vm0, %v345_v8, 0.0  ;;  %v356_v14 = vsel %vm256_vm0, %v346_v12, 0.0  ;;  %v324_v15 = vsel %vm256_vm0, %v314_v13, 0.0  ;;  %v266_v23 = vsel %vm256_vm0, %v1091_v21, 0.0  ;;  %v1123_v37 = vld [vmem:[%s1043_s22 + $0x50] sm:$0xff]  ;;  %v1142_v48 = vld [vmem:[%s1043_s22 + $0x68] sm:$0xff] }
  0x16   : > { %v347_v24 = vmul.f32 %v1078_v16, %v1078_v16  ;;  %v315_v25 = vmul.f32 %v1081_v17, %v1081_v17  ;;  %v348_v28 = vmul.f32 %v1088_v20, %v1088_v20  ;;  %v316_v29 = vmul.f32 %v1091_v21, %v1091_v21  ;;  %v1145_v49 = vld [vmem:[%s1043_s22 + $0x60] sm:$0xff]  ;;  %v1152_v52 = vld [vmem:[%s1043_s22 + $0x78] sm:$0xff]  ;;  %v1155_v53 = vld [vmem:[%s1043_s22 + $0x70] sm:$0xff] }
  0x17   : > { %285 = vadd.xlane.f32.xlu1 %v284_v6  ;;  %282 = vadd.xlane.f32.xlu0 %v281_v7  ;;  %v293_v34 = vsel %vm256_vm0, %v1110_v32, 0.0  ;;  %v269_v35 = vsel %vm256_vm0, %v1113_v33, 0.0  ;;  %v296_v38 = vsel %vm256_vm0, %v1120_v36, 0.0  ;;  %v272_v39 = vsel %vm256_vm0, %v1123_v37, 0.0 }
  0x18   : > { %v359_v26 = vsel %vm256_vm0, %v347_v24, 0.0  ;;  %v327_v27 = vsel %vm256_vm0, %v315_v25, 0.0  ;;  %v362_v30 = vsel %vm256_vm0, %v348_v28, 0.0  ;;  %v330_v31 = vsel %vm256_vm0, %v316_v29, 0.0 }
  0x19   : > { %v349_v40 = vmul.f32 %v1110_v32, %v1110_v32  ;;  %v317_v41 = vmul.f32 %v1113_v33, %v1113_v33  ;;  %v350_v44 = vmul.f32 %v1120_v36, %v1120_v36  ;;  %v318_v45 = vmul.f32 %v1123_v37, %v1123_v37 }
  0x1a   : > { %v299_v50 = vsel %vm256_vm0, %v1142_v48, 0.0  ;;  %v275_v51 = vsel %vm256_vm0, %v1145_v49, 0.0  ;;  %v302_v56 = vsel %vm256_vm0, %v1152_v52, 0.0  ;;  %v278_v57 = vsel %vm256_vm0, %v1155_v53, 0.0 }
  0x1b   : > { %354 = vadd.xlane.f32.xlu1 %v353_v10  ;;  %322 = vadd.xlane.f32.xlu0 %v321_v11  ;;  %v365_v42 = vsel %vm256_vm0, %v349_v40, 0.0  ;;  %v333_v43 = vsel %vm256_vm0, %v317_v41, 0.0  ;;  %v368_v46 = vsel %vm256_vm0, %v350_v44, 0.0  ;;  %v336_v47 = vsel %vm256_vm0, %v318_v45, 0.0 }
  0x1c   : > { %v351_v58 = vmul.f32 %v1142_v48, %v1142_v48  ;;  %v319_v59 = vmul.f32 %v1145_v49, %v1145_v49  ;;  %v352_v62 = vmul.f32 %v1152_v52, %v1152_v52  ;;  %v320_v63 = vmul.f32 %v1155_v53, %v1155_v53 }
  0x1e   : > { %v371_v60 = vsel %vm256_vm0, %v351_v58, 0.0  ;;  %v339_v61 = vsel %vm256_vm0, %v319_v59, 0.0  ;;  %v374_v3 = vsel %vm256_vm0, %v352_v62, 0.0  ;;  %v342_v4 = vsel %vm256_vm0, %v320_v63, 0.0 }
  0x1f   : > { %357 = vadd.xlane.f32.xlu1 %v356_v14  ;;  %325 = vadd.xlane.f32.xlu0 %v324_v15 }
  0x23   : > { %288 = vadd.xlane.f32.xlu1 %v287_v18  ;;  %264 = vadd.xlane.f32.xlu0 %v263_v19 }
  0x27   : > { %291 = vadd.xlane.f32.xlu1 %v290_v22  ;;  %267 = vadd.xlane.f32.xlu0 %v266_v23 }
  0x2b   : > { %360 = vadd.xlane.f32.xlu1 %v359_v26  ;;  %328 = vadd.xlane.f32.xlu0 %v327_v27 }
  0x2f   : > { %363 = vadd.xlane.f32.xlu1 %v362_v30  ;;  %331 = vadd.xlane.f32.xlu0 %v330_v31 }
  0x33   : > { %294 = vadd.xlane.f32.xlu1 %v293_v34  ;;  %270 = vadd.xlane.f32.xlu0 %v269_v35 }
  0x37   : > { %297 = vadd.xlane.f32.xlu1 %v296_v38  ;;  %273 = vadd.xlane.f32.xlu0 %v272_v39 }
  0x3b   : > { %366 = vadd.xlane.f32.xlu1 %v365_v42  ;;  %334 = vadd.xlane.f32.xlu0 %v333_v43 }
  0x3f   : > { %369 = vadd.xlane.f32.xlu1 %v368_v46  ;;  %337 = vadd.xlane.f32.xlu0 %v336_v47 }
  0x43   : > { %300 = vadd.xlane.f32.xlu1 %v299_v50  ;;  %276 = vadd.xlane.f32.xlu0 %v275_v51 }
  0x47   : > { %303 = vadd.xlane.f32.xlu1 %v302_v56  ;;  %279 = vadd.xlane.f32.xlu0 %v278_v57 }
  0x4b   : > { %372 = vadd.xlane.f32.xlu1 %v371_v60  ;;  %340 = vadd.xlane.f32.xlu0 %v339_v61 }
  0x4f   : > { %375 = vadd.xlane.f32.xlu1 %v374_v3  ;;  %343 = vadd.xlane.f32.xlu0 %v342_v4 }
  0xa0   : > { %v262_v6 = vpop.xlane.xlu1 %261  ;;  %v259_v7 = vpop.xlane.xlu0 %258 }
  0xa4   : > { %v286_v8 = vpop.xlane.xlu1 %285  ;;  %v283_v9 = vpop.xlane.xlu0 %282 }
  0xa5   : > { %v305_v10 = vadd.f32 %v283_v9, %v259_v7  ;;  %v306_v11 = vadd.f32 %v286_v8, %v262_v6 }
  0xa7   : > { %v385_v12 = vmul.f32 0.0625, %v305_v10  ;;  %v386_v18 = vmul.f32 0.0625, %v306_v11 }
  0xa8   : > { %v355_v13 = vpop.xlane.xlu1 %354  ;;  %v323_v14 = vpop.xlane.xlu0 %322 }
  0xa9   : > { %v377_v15 = vadd.f32 %v355_v13, %v323_v14  ;;  %v401_v19 = vmul.f32 %v385_v12, %v385_v12  ;;  %v402_v28 = vmul.f32 %v386_v18, %v386_v18  ;;  %v457_v57 = vsub.f32 %v1059_v5, %v385_v12 }
  0xaa   : > { %v441_v58 = vsub.f32 %v1049_v1, %v385_v12  ;;  %v442_v7 = vsub.f32 %v1046_v0, %v386_v18  ;;  %v458_v8 = vsub.f32 %v1052_v2, %v386_v18 }
  0xab   : > { %v393_v22 = vmul.f32 0.0625, %v377_v15 }
  0xac   : > { %v358_v23 = vpop.xlane.xlu1 %357  ;;  %v326_v24 = vpop.xlane.xlu0 %325 }
  0xad   : > { %v409_v25 = vsub.f32 %v393_v22, %v401_v19  ;;  %v378_v26 = vadd.f32 %v358_v23, %v326_v24 }
  0xaf   : > { %v417_v27 = vmax.f32 %v409_v25, 0.0  ;;  %v394_v29 = vmul.f32 0.0625, %v378_v26 }
  0xb0   : > { %v289_v30 = vpop.xlane.xlu1 %288  ;;  %v265_v31 = vpop.xlane.xlu0 %264 }
  0xb1   : > { %v425_v34 = vadd.f32 1e-05, %v417_v27  ;;  %v410_v35 = vsub.f32 %v394_v29, %v402_v28  ;;  %v307_v39 = vadd.f32 %v289_v30, %v265_v31 }
  0xb3   : > { %954 = vrsqrt.f32 %v425_v34  ;;  %v418_v38 = vmax.f32 %v410_v35, 0.0  ;;  %v387_v43 = vmul.f32 0.0625, %v307_v39 }
  0xb4   : > { %v292_v40 = vpop.xlane.xlu1 %291  ;;  %v268_v41 = vpop.xlane.xlu0 %267 }
  0xb5   : > { %v426_v42 = vadd.f32 1e-05, %v418_v38  ;;  %v308_v44 = vadd.f32 %v292_v40, %v268_v41  ;;  %v403_v51 = vmul.f32 %v387_v43, %v387_v43  ;;  %v443_v29 = vsub.f32 %v1081_v17, %v387_v43 }
  0xb6   : > { %v459_v30 = vsub.f32 %v1078_v16, %v387_v43 }
  0xb7   : > { %956 = vrsqrt.f32 %v426_v42  ;;  %v1179_v50 = vmul.f32 0.0625, %v308_v44 }
  0xb8   : > { %v361_v45 = vpop.xlane.xlu1 %360  ;;  %v329_v46 = vpop.xlane.xlu0 %328 }
  0xb9   : > { %v379_v47 = vadd.f32 %v361_v45, %v329_v46  ;;  %v404_v4 = vmul.f32 %v1179_v50, %v1179_v50  ;;  %v444_v46 = vsub.f32 %v1091_v21, %v1179_v50  ;;  %v460_v17 = vsub.f32 %v1088_v20, %v1179_v50 }
  0xbb   : > { %v395_v54 = vmul.f32 0.0625, %v379_v47 }
  0xbc   : > { %v364_v55 = vpop.xlane.xlu1 %363  ;;  %v332_v56 = vpop.xlane.xlu0 %331 }
  0xbd   : > { %v955_v59 = vpop.eup %954  ;;  %v411_v60 = vsub.f32 %v395_v54, %v403_v51  ;;  %v380_v61 = vadd.f32 %v364_v55, %v332_v56 }
  0xbe   : > { %v465_v62 = vmul.f32 %v955_v59, %v457_v57  ;;  %v449_v63 = vmul.f32 %v955_v59, %v441_v58 }
  0xbf   : > { %v419_v3 = vmax.f32 %v411_v60, 0.0  ;;  %v396_v6 = vmul.f32 0.0625, %v380_v61 }
  0xc0   : > { %v295_v9 = vpop.xlane.xlu1 %294  ;;  %896 = vmatprep.mubr.msk.f32.mxu1 %vm256_vm0, %v465_v62  ;;  %910 = vmatprep.mubr.msk.f32.mxu0 %vm256_vm0, %v449_v63  ;;  %v271_v1 = vpop.xlane.xlu0 %270 }
  0xc1   : > { %v957_v5 = vpop.eup %956  ;;  %v427_v10 = vadd.f32 1e-05, %v419_v3  ;;  %v412_v11 = vsub.f32 %v396_v6, %v404_v4  ;;  %v309_v15 = vadd.f32 %v295_v9, %v271_v1 }
  0xc2   : > { %v466_v12 = vmul.f32 %v957_v5, %v458_v8  ;;  %v450_v13 = vmul.f32 %v957_v5, %v442_v7 }
  0xc3   : > { %958 = vrsqrt.f32 %v427_v10  ;;  %v420_v14 = vmax.f32 %v412_v11, 0.0  ;;  %v389_v18 = vmul.f32 0.0625, %v309_v15 }
  0xc4   : > { %v298_v19 = vpop.xlane.xlu1 %297  ;;  %897 = vmatmul.mubr.msk.f32.vlgmr.msra.gmra.mrb[0].mxu1 %vm256_vm0, %v466_v12  ;;  %911 = vmatmul.mubr.msk.f32.vlgmr.msra.gmra.mrb[0].mxu0 %vm256_vm0, %v450_v13  ;;  %v274_v0 = vpop.xlane.xlu0 %273 }
  0xc5   : > { %v428_v2 = vadd.f32 1e-05, %v420_v14  ;;  %v310_v22 = vadd.f32 %v298_v19, %v274_v0  ;;  %v405_v27 = vmul.f32 %v389_v18, %v389_v18  ;;  %v445_v7 = vsub.f32 %v1113_v33, %v389_v18 }
  0xc6   : > { %v461_v8 = vsub.f32 %v1110_v32, %v389_v18 }
  0xc7   : > { %960 = vrsqrt.f32 %v428_v2  ;;  %v1191_v26 = vmul.f32 0.0625, %v310_v22 }
  0xc8   : > { %v367_v23 = vpop.xlane.xlu1 %366  ;;  %v335_v24 = vpop.xlane.xlu0 %334 }
  0xc9   : > { %v381_v25 = vadd.f32 %v367_v23, %v335_v24  ;;  %v406_v44 = vmul.f32 %v1191_v26, %v1191_v26  ;;  %v446_v0 = vsub.f32 %v1123_v37, %v1191_v26  ;;  %v462_v2 = vsub.f32 %v1120_v36, %v1191_v26 }
  0xcb   : > { %v397_v28 = vmul.f32 0.0625, %v381_v25 }
  0xcc   : > { %v370_v31 = vpop.xlane.xlu1 %369  ;;  %v338_v34 = vpop.xlane.xlu0 %337 }
  0xcd   : > { %v959_v35 = vpop.eup %958  ;;  %v413_v38 = vsub.f32 %v397_v28, %v405_v27  ;;  %v382_v39 = vadd.f32 %v370_v31, %v338_v34 }
  0xce   : > { %v467_v40 = vmul.f32 %v959_v35, %v459_v30  ;;  %v451_v41 = vmul.f32 %v959_v35, %v443_v29 }
  0xcf   : > { %v421_v42 = vmax.f32 %v413_v38, 0.0  ;;  %v398_v45 = vmul.f32 0.0625, %v382_v39 }
  0xd0   : > { %v301_v47 = vpop.xlane.xlu1 %300  ;;  %899 = vmatprep.mubr.msk.f32.mxu1 %vm256_vm0, %v467_v40  ;;  %913 = vmatprep.mubr.msk.f32.mxu0 %vm256_vm0, %v451_v41  ;;  %v277_v16 = vpop.xlane.xlu0 %276 }
  0xd1   : > { %v961_v43 = vpop.eup %960  ;;  %v429_v51 = vadd.f32 1e-05, %v421_v42  ;;  %v414_v54 = vsub.f32 %v398_v45, %v406_v44  ;;  %v311_v58 = vadd.f32 %v301_v47, %v277_v16 }
  0xd2   : > { %v468_v55 = vmul.f32 %v961_v43, %v460_v17  ;;  %v452_v56 = vmul.f32 %v961_v43, %v444_v46 }
  0xd3   : > { %962 = vrsqrt.f32 %v429_v51  ;;  %v422_v57 = vmax.f32 %v414_v54, 0.0  ;;  %v391_v50 = vmul.f32 0.0625, %v311_v58 }
  0xd4   : > { %v304_v59 = vpop.xlane.xlu1 %303  ;;  %900 = vmatmul.mubr.msk.f32.gmra.mrb[2].mxu1 %vm256_vm0, %v468_v55  ;;  %914 = vmatmul.mubr.msk.f32.gmra.mrb[2].mxu0 %vm256_vm0, %v452_v56  ;;  %v280_v20 = vpop.xlane.xlu0 %279 }
  0xd5   : > { %v430_v21 = vadd.f32 1e-05, %v422_v57  ;;  %v312_v60 = vadd.f32 %v304_v59, %v280_v20  ;;  %v407_v4 = vmul.f32 %v391_v50, %v391_v50  ;;  %v447_v36 = vsub.f32 %v1145_v49, %v391_v50 }
  0xd6   : > { %v463_v37 = vsub.f32 %v1142_v48, %v391_v50 }
  0xd7   : > { %964 = vrsqrt.f32 %v430_v21  ;;  %v392_v3 = vmul.f32 0.0625, %v312_v60 }
  0xd8   : > { %v373_v61 = vpop.xlane.xlu1 %372  ;;  %v341_v62 = vpop.xlane.xlu0 %340 }
  0xd9   : > { %v383_v63 = vadd.f32 %v373_v61, %v341_v62  ;;  %v408_v15 = vmul.f32 %v392_v3, %v392_v3  ;;  %v448_v29 = vsub.f32 %v1155_v53, %v392_v3  ;;  %v464_v30 = vsub.f32 %v1152_v52, %v392_v3  ;;  %v871_v53 = vld [vmem:[%s1260_s3] ss:$0 sm:$0xff] }
  0xdb   : > { %v399_v6 = vmul.f32 0.0625, %v383_v63 }
  0xdc   : > { %v376_v9 = vpop.xlane.xlu1 %375  ;;  %v344_v1 = vpop.xlane.xlu0 %343 }
  0xdd   : > { %v963_v5 = vpop.eup %962  ;;  %v415_v10 = vsub.f32 %v399_v6, %v407_v4  ;;  %v384_v11 = vadd.f32 %v376_v9, %v344_v1 }
  0xde   : > { %v469_v12 = vmul.f32 %v963_v5, %v461_v8  ;;  %v453_v13 = vmul.f32 %v963_v5, %v445_v7 }
  0xdf   : > { %v423_v14 = vmax.f32 %v415_v10, 0.0  ;;  %v400_v19 = vmul.f32 0.0625, %v384_v11 }
  0xe0   : > { %902 = vmatprep.mubr.msk.f32.mxu1 %vm256_vm0, %v469_v12  ;;  %916 = vmatprep.mubr.msk.f32.mxu0 %vm256_vm0, %v453_v13 }
  0xe1   : > { %v965_v32 = vpop.eup %964  ;;  %v431_v33 = vadd.f32 1e-05, %v423_v14  ;;  %v416_v18 = vsub.f32 %v400_v19, %v408_v15 }
  0xe2   : > { %v470_v22 = vmul.f32 %v965_v32, %v462_v2  ;;  %v454_v23 = vmul.f32 %v965_v32, %v446_v0 }
  0xe3   : > { %966 = vrsqrt.f32 %v431_v33  ;;  %v424_v24 = vmax.f32 %v416_v18, 0.0 }
  0xe4   : > { %903 = vmatmul.mubr.msk.f32.gmra.mrb[4].mxu1 %vm256_vm0, %v470_v22  ;;  %917 = vmatmul.mubr.msk.f32.gmra.mrb[4].mxu0 %vm256_vm0, %v454_v23 }
  0xe5   : > { %v432_v25 = vadd.f32 1e-05, %v424_v24 }
  0xe7   : > { %968 = vrsqrt.f32 %v432_v25 }
  0xed   : > { %v967_v26 = vpop.eup %966 }
  0xee   : > { %v471_v27 = vmul.f32 %v967_v26, %v463_v37  ;;  %v455_v28 = vmul.f32 %v967_v26, %v447_v36 }
  0xf0   : > { %905 = vmatprep.mubr.msk.f32.mxu1 %vm256_vm0, %v471_v27  ;;  %919 = vmatprep.mubr.msk.f32.mxu0 %vm256_vm0, %v455_v28 }
  0xf1   : > { %v969_v31 = vpop.eup %968 }
  0xf2   : > { %v472_v34 = vmul.f32 %v969_v31, %v464_v30  ;;  %v456_v35 = vmul.f32 %v969_v31, %v448_v29 }
  0xf4   : > { %906 = vmatmul.mubr.msk.f32.gmra.mrb[6].mxu1 %vm256_vm0, %v472_v34  ;;  %920 = vmatmul.mubr.msk.f32.gmra.mrb[6].mxu0 %vm256_vm0, %v456_v35 }
 0x197   : > { %v898_v48 = vpop.f32.mrb[0].mxu1  ;;  %v912_v49 = vpop.f32.mrb[0].mxu0 }
 0x198   : > { %v700_v38 = vadd.f32 %v912_v49, %v898_v48  ;;  %v565_v52 = vpop.f32.mrb[1].mxu1  ;;  %v694_v39 = vpop.f32.mrb[1].mxu0 }
 0x199   : > { %v695_v40 = vadd.f32 %v694_v39, %v565_v52 }
 0x19a   : > { %v741_v41 = vadd.f32 %v871_v53, %v700_v38 }
 0x19b   : > { %v740_v42 = vadd.f32 %v871_v53, %v695_v40 }
 0x19c   : > { %749 = vst.msk [vmem:[%s1230_s6 + $0x8] sm:$0xff] %vm256_vm0, %v741_v41 }
 0x19d   : > { %748 = vst.msk [vmem:[%s1230_s6] sm:$0xff] %vm256_vm0, %v740_v42 }
 0x1a7   : > { %v901_v44 = vpop.f32.mrb[2].mxu1  ;;  %v915_v45 = vpop.f32.mrb[2].mxu0 }
 0x1a8   : > { %v710_v46 = vadd.f32 %v915_v45, %v901_v44  ;;  %v575_v17 = vpop.f32.mrb[3].mxu1  ;;  %v704_v47 = vpop.f32.mrb[3].mxu0 }
 0x1a9   : > { %v705_v16 = vadd.f32 %v704_v47, %v575_v17 }
 0x1aa   : > { %v743_v43 = vadd.f32 %v871_v53, %v710_v46 }
 0x1ab   : > { %v742_v51 = vadd.f32 %v871_v53, %v705_v16 }
 0x1ac   : > { %751 = vst.msk [vmem:[%s1230_s6 + $0x18] sm:$0xff] %vm256_vm0, %v743_v43 }
 0x1ad   : > { %750 = vst.msk [vmem:[%s1230_s6 + $0x10] sm:$0xff] %vm256_vm0, %v742_v51 }
 0x1b7   : > { %v904_v54 = vpop.f32.mrb[4].mxu1  ;;  %v918_v55 = vpop.f32.mrb[4].mxu0 }
 0x1b8   : > { %v720_v56 = vadd.f32 %v918_v55, %v904_v54  ;;  %v585_v57 = vpop.f32.mrb[5].mxu1  ;;  %v714_v58 = vpop.f32.mrb[5].mxu0 }
 0x1b9   : > { %v715_v59 = vadd.f32 %v714_v58, %v585_v57 }
 0x1ba   : > { %v745_v20 = vadd.f32 %v871_v53, %v720_v56 }
 0x1bb   : > { %v744_v21 = vadd.f32 %v871_v53, %v715_v59 }
 0x1bc   : > { %753 = vst.msk [vmem:[%s1230_s6 + $0x28] sm:$0xff] %vm256_vm0, %v745_v20 }
 0x1bd   : > { %752 = vst.msk [vmem:[%s1230_s6 + $0x20] sm:$0xff] %vm256_vm0, %v744_v21 }
 0x1c7   : > { %v907_v50 = vpop.f32.mrb[6].mxu1  ;;  %v921_v60 = vpop.f32.mrb[6].mxu0 }
 0x1c8   : > { %v730_v61 = vadd.f32 %v921_v60, %v907_v50  ;;  %v595_v62 = vpop.f32.mrb[7].mxu1  ;;  %v724_v63 = vpop.f32.mrb[7].mxu0 }
 0x1c9   : > { %v725_v3 = vadd.f32 %v724_v63, %v595_v62 }
 0x1ca   : > { %v747_v4 = vadd.f32 %v871_v53, %v730_v61 }
 0x1cb   : > { %v746_v6 = vadd.f32 %v871_v53, %v725_v3 }
 0x1cc   : > { %755 = vst.msk [vmem:[%s1230_s6 + $0x38] sm:$0xff] %vm256_vm0, %v747_v4 }
 0x1cd   : > { %754 = vst.msk [vmem:[%s1230_s6 + $0x30] sm:$0xff] %vm256_vm0, %v746_v6 }
 0x1ce PF: > { %s14_s17 = sadd.s32 1, %s992_s17   ;;  %s1262_s15 = smov %s988_s16 }
 0x1cf   : > { %p11_p5 = scmp.ge.s32.totalorder %s14_s17, 4   ;;  %s1263_s16 = smov %s1265_s18 }
 0x1d1   :  { %13 = sbr.rel (!%p11_p5) target bundleno = 2 (0x2), region = 66 }

</bundles_post_ra>
